<compile_context>
chip_gen: v7x
topology: tpu7x:2x2x1
jax: 0.10.0
libtpu: 0.0.40
codegen_flags: <defaults>
</compile_context>

<pallas_src>
import jax
import jax.numpy as jnp
from jax.experimental import pallas as pl
from jax.experimental.pallas import tpu as pltpu

BN_EPS = 1e-5


def _vmem_capacity_bytes():
    """Physical VMEM per TensorCore; conservative fallback = v7x (64 MiB)."""
    try:
        info = pltpu.get_tpu_info()
        cap = getattr(info, "vmem_capacity_bytes", None)
        if cap:
            return int(cap)
    except Exception:
        pass
    return 64 * 1024 * 1024


def _channel_block_candidates(C, itemsize):
    """Channel-block sizes that tile C exactly, largest first.

    Prefers blocks aligned to the packed-sublane size (8 f32 / 16 bf16 /
    32 int8).  If C has no such divisor (e.g. C < 8 or odd C), fall back to a
    single full-dim block, which the (8,128) rule allows and which avoids any
    padding (and its extra HBM passes) in the wrapper.
    """
    sub = 8 * max(1, 4 // max(1, itemsize))
    divisors = [cb for cb in (512, 256, 128, 64, 32, 16, 8) if C % cb == 0]
    aligned = [cb for cb in divisors if cb % sub == 0]
    rest = [cb for cb in divisors if cb % sub != 0]
    cands = aligned + rest
    return cands if cands else [C]


def _pick_c_block(C, candidates, fits):
    """Largest fitting candidate, preferring >=2 blocks (v7x megacore)."""
    fitting = [cb for cb in candidates if fits(cb)]
    if not fitting:
        return None
    multi = [cb for cb in fitting if C // cb >= 2]
    return multi[0] if multi else fitting[0]


# --------------------------------------------------------------------------
# Path A: VMEM-resident single-read fast path (grid over channel blocks only)
# --------------------------------------------------------------------------
def _make_resident_kernel(count):
    inv_count = 1.0 / float(count)

    def kernel(x_ref, gamma_ref, beta_ref, o_ref):
        # x_ref/o_ref: (N, c_blk, HW); gamma/beta: (1, c_blk, 1)
        y = jnp.maximum(x_ref[...], 0.0).astype(jnp.float32)   # inner module: ReLU
        # Per-channel sums: lane (XLU) reduce, then vreg adds over the batch dim.
        s = jnp.sum(jnp.sum(y, axis=2, keepdims=True), axis=0, keepdims=True)
        q = jnp.sum(jnp.sum(y * y, axis=2, keepdims=True), axis=0, keepdims=True)
        mean = s * inv_count
        var = jnp.maximum(q * inv_count - mean * mean, 0.0)
        inv_std = jax.lax.rsqrt(var + BN_EPS)
        scale = inv_std * gamma_ref[...]
        shift = beta_ref[...] - mean * scale
        o_ref[...] = (y * scale + shift).astype(o_ref.dtype)

    return kernel


# --------------------------------------------------------------------------
# Path B: two-pass streaming reduction (arbitrary activation sizes)
# --------------------------------------------------------------------------
def _make_streaming_kernel(count, hw, tm, num_mt, mask_needed):
    inv_count = 1.0 / float(count)

    def kernel(x_ref, gamma_ref, beta_ref, o_ref, sum_ref, ssq_ref):
        # x_ref/o_ref: (n_blk, c_blk, tm); gamma/beta/scratch: (1, c_blk, 1)
        phase = pl.program_id(1)
        n = pl.program_id(2)
        m = pl.program_id(3)

        y = jnp.maximum(x_ref[...], 0.0).astype(jnp.float32)   # inner module: ReLU

        @pl.when((phase == 0) & (n == 0) & (m == 0))
        def _():
            sum_ref[...] = jnp.zeros_like(sum_ref)
            ssq_ref[...] = jnp.zeros_like(ssq_ref)

        @pl.when(phase == 0)
        def _():
            def accumulate(yv):
                sum_ref[...] += jnp.sum(
                    jnp.sum(yv, axis=2, keepdims=True), axis=0, keepdims=True)
                ssq_ref[...] += jnp.sum(
                    jnp.sum(yv * yv, axis=2, keepdims=True), axis=0, keepdims=True)

            if mask_needed:
                # Only the last spatial tile overruns H*W; interior tiles skip
                # the iota/compare/select entirely.
                @pl.when(m == num_mt - 1)
                def _():
                    lane = jax.lax.broadcasted_iota(jnp.int32, y.shape, 2)
                    accumulate(jnp.where((m * tm + lane) < hw, y, 0.0))

                @pl.when(m < num_mt - 1)
                def _():
                    accumulate(y)
            else:
                accumulate(y)

        @pl.when(phase == 1)
        def _():
            mean = sum_ref[...] * inv_count
            var = jnp.maximum(ssq_ref[...] * inv_count - mean * mean, 0.0)
            inv_std = jax.lax.rsqrt(var + BN_EPS)
            scale = inv_std * gamma_ref[...]
            shift = beta_ref[...] - mean * scale
            o_ref[...] = (y * scale + shift).astype(o_ref.dtype)

    return kernel


def with_batchnorm2d_forward(x_nchw, gamma, beta, *,
                             _force_streaming=False, _row_cap_elems=None):
    """x_nchw: (N, C, H, W); gamma/beta: (C,).  Returns (N, C, H, W)."""
    N, C, H, W = x_nchw.shape
    HW = H * W
    out_dtype = x_nchw.dtype
    in_itemsize = jnp.dtype(x_nchw.dtype).itemsize
    out_itemsize = jnp.dtype(out_dtype).itemsize
    count = N * HW

    # Free reshape (merges contiguous trailing dims) -- no transpose, no pad.
    x3 = x_nchw.reshape(N, C, HW)
    g3 = gamma.reshape(1, C, 1).astype(jnp.float32)
    b3 = beta.reshape(1, C, 1).astype(jnp.float32)

    # Generation-aware VMEM budget: v5e/v6e (128 MiB) -> 96 MiB limit,
    # v7x (64 MiB) -> 48 MiB limit.
    vmem_cap = _vmem_capacity_bytes()
    vmem_limit = max(32 * 1024 * 1024, min((vmem_cap * 3) // 4, 96 * 1024 * 1024))

    candidates = _channel_block_candidates(C, in_itemsize)

    # ---------------- Path A: resident single-read fast path ----------------
    # Budget: double-buffered in + out slabs plus headroom for the f32
    # intermediates materialized inside the kernel body.
    resident_budget = (vmem_limit * 7) // 10
    per_elem_bytes = 2 * in_itemsize + 2 * out_itemsize + 3 * 4

    def resident_fits(cb):
        return N * cb * HW * per_elem_bytes <= resident_budget

    c_blk = None if _force_streaming else _pick_c_block(C, candidates, resident_fits)

    if c_blk is not None:
        out3 = pl.pallas_call(
            _make_resident_kernel(count),
            out_shape=jax.ShapeDtypeStruct((N, C, HW), out_dtype),
            grid_spec=pltpu.PrefetchScalarGridSpec(
                num_scalar_prefetch=0,
                grid=(C // c_blk,),
                in_specs=[
                    pl.BlockSpec((N, c_blk, HW), lambda c: (0, c, 0)),
                    pl.BlockSpec((1, c_blk, 1), lambda c: (0, c, 0)),
                    pl.BlockSpec((1, c_blk, 1), lambda c: (0, c, 0)),
                ],
                out_specs=pl.BlockSpec((N, c_blk, HW), lambda c: (0, c, 0)),
            ),
            compiler_params=pltpu.CompilerParams(
                dimension_semantics=("parallel",),
                vmem_limit_bytes=vmem_limit,
            ),
        )(x3, g3, b3)
        return out3.reshape(N, C, H, W)

    # ---------------- Path B: two-pass streaming fallback --------------------
    c_blk = _pick_c_block(C, candidates, lambda cb: True)

    # ~2 MiB of f32 per block (tm up to 8K-16K lanes depending on c_blk):
    # long unmasked DMAs, per-step overhead amortized, well under VMEM limits
    # on every generation with double-buffered in/out + f32 temporaries.
    block_budget = 2 * 1024 * 1024
    row_cap = max(512, block_budget // (4 * c_blk))
    if _row_cap_elems is not None:
        row_cap = int(_row_cap_elems)

    if HW <= row_cap:
        # Small spatial extent: take the full row and fold the batch axis into
        # the block so DMAs stay long and grid steps stay few.
        tm, num_mt, mask_needed = HW, 1, False
        n_cap = max(1, row_cap // HW)
        n_blk = max(d for d in range(1, N + 1) if N % d == 0 and d <= n_cap)
    else:
        n_blk = 1
        tm = max(128, (row_cap // 128) * 128)   # lane-dense multiple of 128
        num_mt = pl.cdiv(HW, tm)
        mask_needed = (HW % tm) != 0
    num_nt = N // n_blk

    grid = (C // c_blk, 2, num_nt, num_mt)
    kernel = _make_streaming_kernel(count, HW, tm, num_mt, mask_needed)

    out3 = pl.pallas_call(
        kernel,
        out_shape=jax.ShapeDtypeStruct((N, C, HW), out_dtype),
        grid_spec=pltpu.PrefetchScalarGridSpec(
            num_scalar_prefetch=0,
            grid=grid,
            in_specs=[
                # x: streamed block per (n, c, m); re-read in both phases.
                pl.BlockSpec((n_blk, c_blk, tm), lambda c, p, n, m: (n, c, m)),
                # gamma/beta: resident per channel block (DMA'd once per c).
                pl.BlockSpec((1, c_blk, 1), lambda c, p, n, m: (0, c, 0)),
                pl.BlockSpec((1, c_blk, 1), lambda c, p, n, m: (0, c, 0)),
            ],
            # During phase 0 the output index stays (0, c, 0) so no writebacks
            # occur while stats accumulate; phase 1 streams normalized tiles.
            out_specs=pl.BlockSpec(
                (n_blk, c_blk, tm), lambda c, p, n, m: (n * p, c, m * p)),
            scratch_shapes=[
                pltpu.VMEM((1, c_blk, 1), jnp.float32),  # per-channel sum
                pltpu.VMEM((1, c_blk, 1), jnp.float32),  # per-channel sum of sq
            ],
        ),
        compiler_params=pltpu.CompilerParams(
            dimension_semantics=("parallel", "arbitrary", "arbitrary", "arbitrary"),
            vmem_limit_bytes=vmem_limit,
        ),
    )(x3, g3, b3)
    return out3.reshape(N, C, H, W)


def reference_forward(x_nchw, gamma, beta):
    y = jnp.maximum(x_nchw, 0.0)
    mean = jnp.mean(y, axis=(0, 2, 3), keepdims=True)
    var = jnp.mean((y - mean) ** 2, axis=(0, 2, 3), keepdims=True)
    g = gamma.reshape(1, -1, 1, 1)
    b = beta.reshape(1, -1, 1, 1)
    return (y - mean) * jax.lax.rsqrt(var + BN_EPS) * g + b


if __name__ == "__main__":
    key = jax.random.PRNGKey(0)
    k0, k1 = jax.random.split(key)

    def check(x, gamma, beta, **kw):
        out = jax.block_until_ready(with_batchnorm2d_forward(x, gamma, beta, **kw))
        ref = reference_forward(x, gamma, beta)
        assert out.shape == x.shape and out.dtype == x.dtype
        assert jnp.allclose(out, ref, atol=1e-4, rtol=1e-4), \
            float(jnp.max(jnp.abs(out - ref)))

    # Primary case (module spec): batch=2, channels=4, spatial=16x16.
    # Exercises the VMEM-resident single-read fast path and the no-padding
    # full-dim channel block (C=4 < 8).
    N, C, H, W = 2, 4, 16, 16
    x = jax.random.normal(k0, (N, C, H, W), dtype=jnp.float32)
    gamma = 1.0 + 0.1 * jnp.arange(C, dtype=jnp.float32)
    beta = 0.01 * jnp.arange(C, dtype=jnp.float32)
    check(x, gamma, beta)

    # Streaming fallback: multiple spatial tiles with a masked boundary tile.
    x2 = jax.random.normal(k1, (2, 4, 18, 18), dtype=jnp.float32)
    check(x2, gamma, beta, _force_streaming=True, _row_cap_elems=128)

    # Streaming fallback with the batch axis folded into the block (n_blk > 1).
    C8 = 8
    x3 = jax.random.normal(k1, (4, C8, 8, 8), dtype=jnp.float32)
    gamma8 = 1.0 + 0.1 * jnp.arange(C8, dtype=jnp.float32)
    beta8 = 0.01 * jnp.arange(C8, dtype=jnp.float32)
    check(x3, gamma8, beta8, _force_streaming=True, _row_cap_elems=128)

    print("KERNEL_OK")
</pallas_src>

<mosaic_0001>
module attributes {stable_mosaic.version = 11 : i64} {
  func.func @kernel(%arg0: i32, %arg1: memref<2x4x256xf32, #tpu.memory_space<vmem>>, %arg2: memref<1x4x1xf32, #tpu.memory_space<vmem>>, %arg3: memref<1x4x1xf32, #tpu.memory_space<vmem>>, %arg4: memref<2x4x256xf32, #tpu.memory_space<vmem>>) attributes {dimension_semantics = [#tpu.dimension_semantics<parallel>], iteration_bounds = array<i64: 1>, scalar_prefetch = 0 : i64, scratch_operands = 0 : i64, tpu.core_type = #tpu.core_type<tc>, window_params = [{transform_indices = @transform_0, window_bounds = array<i64: 2, 4, 256>}, {transform_indices = @transform_1, window_bounds = array<i64: 1, 4, 1>}, {transform_indices = @transform_2, window_bounds = array<i64: 1, 4, 1>}, {transform_indices = @transform_3, window_bounds = array<i64: 2, 4, 256>}]} {
    %c0 = arith.constant 0 : index
    %c0_0 = arith.constant 0 : index
    %c0_1 = arith.constant 0 : index
    %0 = vector.load %arg1[%c0, %c0_0, %c0_1] : memref<2x4x256xf32, #tpu.memory_space<vmem>>, vector<2x4x256xf32>
    %cst = arith.constant 0.000000e+00 : f32
    %1 = vector.broadcast %cst : f32 to vector<2x4x256xf32>
    %2 = arith.maximumf %0, %1 : vector<2x4x256xf32>
    %cst_2 = arith.constant dense<0.000000e+00> : vector<2x4xf32>
    %3 = vector.multi_reduction <add>, %2, %cst_2 [2] : vector<2x4x256xf32> to vector<2x4xf32>
    %4 = vector.shape_cast %3 : vector<2x4xf32> to vector<2x4x1xf32>
    %cst_3 = arith.constant dense<0.000000e+00> : vector<4x1xf32>
    %5 = vector.multi_reduction <add>, %4, %cst_3 [0] : vector<2x4x1xf32> to vector<4x1xf32>
    %6 = vector.shape_cast %5 : vector<4x1xf32> to vector<1x4x1xf32>
    %7 = arith.mulf %2, %2 : vector<2x4x256xf32>
    %cst_4 = arith.constant dense<0.000000e+00> : vector<2x4xf32>
    %8 = vector.multi_reduction <add>, %7, %cst_4 [2] : vector<2x4x256xf32> to vector<2x4xf32>
    %9 = vector.shape_cast %8 : vector<2x4xf32> to vector<2x4x1xf32>
    %cst_5 = arith.constant dense<0.000000e+00> : vector<4x1xf32>
    %10 = vector.multi_reduction <add>, %9, %cst_5 [0] : vector<2x4x1xf32> to vector<4x1xf32>
    %11 = vector.shape_cast %10 : vector<4x1xf32> to vector<1x4x1xf32>
    %cst_6 = arith.constant 0.001953125 : f32
    %12 = vector.broadcast %cst_6 : f32 to vector<1x4x1xf32>
    %13 = arith.mulf %6, %12 : vector<1x4x1xf32>
    %cst_7 = arith.constant 0.001953125 : f32
    %14 = vector.broadcast %cst_7 : f32 to vector<1x4x1xf32>
    %15 = arith.mulf %11, %14 : vector<1x4x1xf32>
    %16 = arith.mulf %13, %13 : vector<1x4x1xf32>
    %17 = arith.subf %15, %16 : vector<1x4x1xf32>
    %cst_8 = arith.constant 0.000000e+00 : f32
    %18 = vector.broadcast %cst_8 : f32 to vector<1x4x1xf32>
    %19 = arith.maximumf %17, %18 : vector<1x4x1xf32>
    %cst_9 = arith.constant 9.99999974E-6 : f32
    %20 = vector.broadcast %cst_9 : f32 to vector<1x4x1xf32>
    %21 = arith.addf %19, %20 : vector<1x4x1xf32>
    %22 = math.rsqrt %21 : vector<1x4x1xf32>
    %c0_10 = arith.constant 0 : index
    %c0_11 = arith.constant 0 : index
    %c0_12 = arith.constant 0 : index
    %23 = vector.load %arg2[%c0_10, %c0_11, %c0_12] : memref<1x4x1xf32, #tpu.memory_space<vmem>>, vector<1x4x1xf32>
    %24 = arith.mulf %22, %23 : vector<1x4x1xf32>
    %c0_13 = arith.constant 0 : index
    %c0_14 = arith.constant 0 : index
    %c0_15 = arith.constant 0 : index
    %25 = vector.load %arg3[%c0_13, %c0_14, %c0_15] : memref<1x4x1xf32, #tpu.memory_space<vmem>>, vector<1x4x1xf32>
    %26 = arith.mulf %13, %24 : vector<1x4x1xf32>
    %27 = arith.subf %25, %26 : vector<1x4x1xf32>
    %28 = vector.broadcast %24 : vector<1x4x1xf32> to vector<2x4x256xf32>
    %29 = arith.mulf %2, %28 : vector<2x4x256xf32>
    %30 = vector.broadcast %27 : vector<1x4x1xf32> to vector<2x4x256xf32>
    %31 = arith.addf %29, %30 : vector<2x4x256xf32>
    %c0_16 = arith.constant 0 : index
    %c0_17 = arith.constant 0 : index
    %c0_18 = arith.constant 0 : index
    %32 = vector.load %arg4[%c0_16, %c0_17, %c0_18] : memref<2x4x256xf32, #tpu.memory_space<vmem>>, vector<2x4x256xf32>
    tpu.vector_store %arg4[%c0_16, %c0_17, %c0_18], %31 {strides = array<i32>} : memref<2x4x256xf32, #tpu.memory_space<vmem>>, vector<2x4x256xf32>,
    return
  }
  func.func @transform_0(%arg0: i32) -> (i32, i32, i32) {
    %c0_i32 = arith.constant 0 : i32
    %c0_i32_0 = arith.constant 0 : i32
    %c0_i32_1 = arith.constant 0 : i32
    return %c0_i32, %arg0, %c0_i32_0 : i32, i32, i32
  }
  func.func @transform_1(%arg0: i32) -> (i32, i32, i32) {
    %c0_i32 = arith.constant 0 : i32
    %c0_i32_0 = arith.constant 0 : i32
    %c0_i32_1 = arith.constant 0 : i32
    return %c0_i32, %arg0, %c0_i32_0 : i32, i32, i32
  }
  func.func @transform_2(%arg0: i32) -> (i32, i32, i32) {
    %c0_i32 = arith.constant 0 : i32
    %c0_i32_0 = arith.constant 0 : i32
    %c0_i32_1 = arith.constant 0 : i32
    return %c0_i32, %arg0, %c0_i32_0 : i32, i32, i32
  }
  func.func @transform_3(%arg0: i32) -> (i32, i32, i32) {
    %c0_i32 = arith.constant 0 : i32
    %c0_i32_0 = arith.constant 0 : i32
    %c0_i32_1 = arith.constant 0 : i32
    return %c0_i32, %arg0, %c0_i32_0 : i32, i32, i32
  }
}

</mosaic_0001>

<bundles_post_ra>
// kernel: tpu_custom_call.1
= control target key start
LH: loop header
LB: loop body
LE: loop exit
PB: predicated region body
PF: predicated region fallthrough
CT: control target
= control target key end

     0   :  { %8 = vsyncpa [#allocation3], 0  ;;  %s281_s0 = inlined_call_operand.hbm [shape: f32[2,4,256], index: 0, kind: input, shape index: {}]   ;;  %s282_s1 = inlined_call_operand.vmem [shape: f32[1,4,1], index: 1, kind: input, shape index: {}]   ;;  %s283_s2 = inlined_call_operand.vmem [shape: f32[1,4,1], index: 2, kind: input, shape index: {}]   ;;  %s284_s3 = inlined_call_operand.hbm [shape: f32[2,4,256], index: 3, kind: output, shape index: {}]  }
   0x1   :  { %9 = vsyncpa [#allocation4], 0  ;;  %s191_s12 = smov [#allocation2]   ;;  %s143_s16 = scalar_lea.hbm %s281_s0, 256 }
   0x2   :  { %s15_s13 = sshll.u32 %s191_s12, 4  ;;  %p144_p0 = scmp.ne.s32.totalorder %s281_s0, %s143_s16  ;;  %s16_s13 = int_to_ptr.vmem [resolvable:$true] %s15_s13 }
   0x3   :  { %p147_p1 = scmp.lt.u32.totalorder %s143_s16, %s281_s0 }
   0x5   :  { %p149_p2 = pnand %p147_p1, %p144_p0 }
   0x7   :  { %152 = shalt.err (!%p149_p2)
}
   0x8   :  { %s153_s21 = scalar_lea.vmem %s16_s13, 256  ;;  %p158_p4 = scmp.lt.s32.totalorder %s16_s13, %s16_s13 }
   0x9   :  { %p154_p3 = scmp.ne.s32.totalorder %s16_s13, %s153_s21  ;;  %p159_p5 = scmp.lt.s32.totalorder %s153_s21, %s153_s21 }
   0xb   :  { %p160_p6 = por %p159_p5, %p158_p4 }
   0xd   :  { %p161_p7 = pnand %p160_p6, %p154_p3 }
   0xf   :  { %164 = shalt.err (!%p161_p7)
}
  0x10   :  { %s192_s22 = smov 128   ;;  %s193_s23 = smov 8  }
  0x11   :  { %21 = dma.hbm_to_vmem [thread:$0]  %s281_s0, 256, %s16_s13, [#allocation3], %s192_s22, %s192_s22, %s193_s23  }
  0x12   :  { %187 = dma.done.wait [#allocation3], 256  }
  0x13   :  { %188 = vsyncadd [#allocation3], 4294967040  ;;  %v29_v0 = vld [vmem:[#allocation2] sm:$0xff]  ;;  %vm39_vm0 = vcmask 1043456   ;;  %v30_v1 = vld [vmem:[#allocation2 + $0x8] sm:$0xff]  ;;  %v194_v22 = vmov 0   ;;  %v93_v47 = vlaneseq }
  0x14   :  { %v232_v2 = vmax.f32 %v29_v0, 0.0  ;;  %v234_v3 = vmax.f32 %v30_v1, 0.0  ;;  %139 = vset.pattern.permute.xlu0 %v194_v22  ;;  %140 = vset.pattern.permute.xlu1 %v194_v22  ;;  %v81_v39 = vld [vmem:[%s282_s1] sm:$0xf]  ;;  %v195_v45 = vmov 839922192  }
  0x15   :  { %v83_v42 = vld [vmem:[%s283_s2] sm:$0xf]  ;;  %v91_v46 = vunpack.c.l.s4 %v195_v45  ;;  %v94_v49 = vshrl.u32 %v93_v47, 7  ;;  %s196_s1 = smov [#allocation5]  }
  0x16   :  { %v35_v4 = vcombine.high %v232_v2, %v232_v2  ;;  %v40_v5 = vsel %vm39_vm0, %v232_v2, 0.0  ;;  %v53_v6 = vmul.f32 %v232_v2, %v232_v2  ;;  %v36_v7 = vcombine.high %v234_v3, %v234_v3  ;;  %s121_s29 = sshll.u32 %s196_s1, 4  ;;  %s122_s29 = int_to_ptr.vmem [resolvable:$true] %s121_s29 }
  0x17   :  { %v45_v8 = vsel %vm39_vm0, %v234_v3, 0.0  ;;  %v54_v9 = vmul.f32 %v234_v3, %v234_v3  ;;  %v92_v48 = vunpack.c.0.s8 %v91_v46  ;;  %s165_s2 = scalar_lea.vmem %s122_s29, 256  ;;  %p170_p9 = scmp.lt.s32.totalorder %s122_s29, %s122_s29 }
  0x18   :  { %v41_v10 = vsel %vm39_vm0, %v35_v4, 0.0  ;;  %v57_v11 = vcombine.high %v53_v6, %v53_v6  ;;  %v61_v12 = vsel %vm39_vm0, %v53_v6, 0.0  ;;  %v46_v13 = vsel %vm39_vm0, %v36_v7, 0.0  ;;  %p166_p8 = scmp.ne.s32.totalorder %s122_s29, %s165_s2  ;;  %p171_p10 = scmp.lt.s32.totalorder %s165_s2, %s165_s2 }
  0x19   :  { %v42_v14 = vadd.f32 %v41_v10, %v40_v5  ;;  %v58_v15 = vcombine.high %v54_v9, %v54_v9  ;;  %v66_v17 = vsel %vm39_vm0, %v54_v9, 0.0  ;;  %v47_v19 = vadd.f32 %v46_v13, %v45_v8 }
  0x1a   :  { %v62_v16 = vsel %vm39_vm0, %v57_v11, 0.0  ;;  %v95_v50 = vsub.s32 %v92_v48, %v94_v49  ;;  %p172_p11 = por %p171_p10, %p170_p9 }
  0x1b   :  { %43 = vadd.xlane.f32.xlu0 %v42_v14  ;;  %v63_v18 = vadd.f32 %v62_v16, %v61_v12  ;;  %v67_v20 = vsel %vm39_vm0, %v58_v15, 0.0 }
  0x1c   :  { %v68_v21 = vadd.f32 %v67_v20, %v66_v17  ;;  %p173_p12 = pnand %p172_p11, %p166_p8 }
  0x1d   :  { %64 = vadd.xlane.f32.xlu1 %v63_v18 }
  0x1f   :  { %48 = vadd.xlane.f32.xlu0 %v47_v19 }
  0x21   :  { %69 = vadd.xlane.f32.xlu1 %v68_v21 }
  0xa8   :  { %v44_v23 = vpop.xlane.xlu0 %43 }
  0xa9   :  { %v50_v26 = vsel %vm39_vm0, %v44_v23, 0.0 }
  0xaa   :  { %v65_v24 = vpop.xlane.xlu1 %64 }
  0xab   :  { %v71_v30 = vsel %vm39_vm0, %v65_v24, 0.0 }
  0xac   :  { %v49_v25 = vpop.xlane.xlu0 %48 }
  0xad   :  { %v51_v27 = vsel %vm39_vm0, %v49_v25, 0.0 }
  0xae   :  { %v52_v28 = vadd.f32 %v51_v27, %v50_v26  ;;  %v70_v29 = vpop.xlane.xlu1 %69 }
  0xaf   :  { %v72_v31 = vsel %vm39_vm0, %v70_v29, 0.0 }
  0xb0   :  { %v74_v32 = vmul.f32 0.001953125, %v52_v28  ;;  %v73_v33 = vadd.f32 %v72_v31, %v71_v30 }
  0xb2   :  { %v76_v34 = vmul.f32 %v74_v32, %v74_v32  ;;  %v75_v35 = vmul.f32 0.001953125, %v73_v33 }
  0xb4   :  { %v77_v36 = vsub.f32 %v75_v35, %v76_v34 }
  0xb6   :  { %v78_v37 = vmax.f32 %v77_v36, 0.0 }
  0xb8   :  { %v79_v38 = vadd.f32 1e-05, %v78_v37 }
  0xba   :  { %141 = vrsqrt.f32 %v79_v38 }
  0xc4   :  { %v142_v40 = vpop.eup %141 }
  0xc5   :  { %v82_v41 = vmul.f32 %v142_v40, %v81_v39 }
  0xc7   :  { %88 = vperm.xlu0 %139, %v82_v41   ;;  %v84_v43 = vmul.f32 %v82_v41, %v74_v32 }
  0xc9   :  { %v85_v44 = vsub.f32 %v83_v42, %v84_v43 }
  0xcb   :  { %102 = vperm.xlu1 %140, %v85_v44  }
 0x146   :  { %v89_v51 = vpop.permute.xlu0 %88 }
 0x147   :  { %v96_v52 = vrot.slane %v89_v51, %v95_v50 }
 0x149   :  { %v98_v54 = vmul.f32 %v96_v52, %v232_v2  ;;  %v99_v55 = vmul.f32 %v96_v52, %v234_v3 }
 0x14a   :  { %v103_v53 = vpop.permute.xlu1 %102 }
 0x14b   :  { %v110_v56 = vrot.slane %v103_v53, %v95_v50 }
 0x14d   :  { %v112_v57 = vadd.f32 %v110_v56, %v98_v54  ;;  %v113_v58 = vadd.f32 %v110_v56, %v99_v55 }
 0x14f   :  { %114 = vst [vmem:[#allocation5] sm:$0xff] %v112_v57  ;;  %115 = vst [vmem:[#allocation5 + $0x8] sm:$0xff] %v113_v58 }
 0x150   :  { %176 = shalt.err (!%p173_p12)
}
 0x151   :  { %s177_s5 = scalar_lea.hbm %s284_s3, 256 }
 0x152   :  { %p178_p13 = scmp.ne.s32.totalorder %s284_s3, %s177_s5  ;;  %p181_p0 = scmp.lt.u32.totalorder %s177_s5, %s284_s3 }
 0x154   :  { %p183_p1 = pnand %p181_p0, %p178_p13 }
 0x156   :  { %186 = shalt.err (!%p183_p1)
}
 0x157   :  { %127 = dma.vmem_to_hbm [thread:$0]  %s122_s29, 256, %s284_s3, [#allocation4], %s192_s22, %s192_s22, %s193_s23  }
 0x158   :  { %189 = dma.done.wait [#allocation4], 256  }
 0x159   :  { %190 = vsyncadd [#allocation4], 4294967040 }
 0x15a   :  { %131 = vsyncpa [#allocation3], 1 }
 0x15b   :  { %132 = vsyncpa [#allocation4], 1 }

</bundles_post_ra>
